<compile_context>
chip_gen: v7x
topology: tpu7x:2x2x1
jax: 0.10.0
libtpu: 0.0.40
codegen_flags: <defaults>
</compile_context>

<pallas_src>
import functools

import jax
import jax.numpy as jnp
from jax.experimental import pallas as pl
from jax.experimental.pallas import tpu as pltpu


# ---------------------------------------------------------------------------
# Kernels
# ---------------------------------------------------------------------------

def _se_fused_kernel(x_ref, w1_ref, w2_ref, o_ref, *, inv_hw):
    # x_ref/o_ref: (TB, C, HW)   w1_ref: (C, Cr)   w2_ref: (Cr, C)
    x = x_ref[...]  # streaming dtype; f32 upcast below fuses per-vreg

    # Squeeze: per-channel mean over the true spatial size (f32 accumulate).
    y = jnp.sum(x.astype(jnp.float32), axis=-1) * inv_hw            # (TB, C)

    # Excite: fc1 -> ReLU -> fc2 -> sigmoid on the tiny (TB, C) path.
    h = jnp.dot(y, w1_ref[...], preferred_element_type=jnp.float32)
    h = jnp.maximum(h, 0.0)
    s = jnp.dot(h, w2_ref[...], preferred_element_type=jnp.float32)
    s = jax.nn.sigmoid(s)                                            # (TB, C)

    # Scale: broadcast the per-channel gate over the spatial (lane) axis.
    gate = s.astype(x.dtype)[:, :, None]                             # (TB, C, 1)
    o_ref[...] = (x * gate).astype(o_ref.dtype)


def _squeeze_kernel(x_ref, sum_ref, *, hw, thw):
    # x_ref: (1, C, THW)   sum_ref: (1, 1, C) f32 accumulator (resident over t)
    t = pl.program_id(1)

    @pl.when(t == 0)
    def _():
        sum_ref[...] = jnp.zeros_like(sum_ref)

    x = x_ref[...].astype(jnp.float32)
    # Mask out-of-bounds lanes of a partial tail block (reads are unspecified).
    col = jax.lax.broadcasted_iota(jnp.int32, x.shape, 2) + t * thw
    x = jnp.where(col < hw, x, 0.0)
    sum_ref[...] += jnp.sum(x, axis=-1)[:, None, :]


def _scale_kernel(x_ref, g_ref, o_ref):
    # x_ref/o_ref: (1, C, THW)   g_ref: (1, C, 1)
    o_ref[...] = (x_ref[...] * g_ref[...]).astype(o_ref.dtype)


# ---------------------------------------------------------------------------
# Tiling helpers (generation-aware)
# ---------------------------------------------------------------------------

def _vmem_capacity_bytes():
    """Per-core VMEM capacity; conservative (v7x) default if unavailable."""
    try:
        cap = getattr(pltpu.get_tpu_info(), "vmem_capacity_bytes", None)
        if cap:
            return int(cap)
    except Exception:
        pass
    return 64 * 1024 * 1024


def _choose_batch_tile(B, C, HW, dtype_bytes, target_block_bytes, max_block_bytes):
    """Pick TB | B such that double-buffered in+out blocks fit the VMEM budget,
    blocks are ~target_block_bytes, and the grid has >= 4 (preferably even)
    steps.  Returns None if even TB=1 does not fit (-> two-phase fallback)."""
    per_b = C * HW * dtype_bytes
    divisors = [d for d in range(1, B + 1) if B % d == 0]
    fitting = [d for d in divisors if 4 * d * per_b <= max_block_bytes]
    if not fitting:
        return None
    small = [d for d in fitting if d * per_b <= target_block_bytes] or [min(fitting)]
    cands = [d for d in small if B // d >= 4] or small
    even = [d for d in cands if (B // d) % 2 == 0] or cands
    return max(even)


def _choose_hw_tile(C, HW, dtype_bytes, target_block_bytes):
    """Lane-aligned HW tile (multiple of 128) of ~target_block_bytes; full HW
    if the whole spatial extent already fits a single block."""
    per_col = max(1, C * dtype_bytes)
    thw = max(128, (target_block_bytes // per_col) // 128 * 128)
    if thw >= HW:
        return HW
    return thw


# ---------------------------------------------------------------------------
# Wrapper
# ---------------------------------------------------------------------------

def se_layer(x, w_fc1, w_fc2, *,
             target_block_bytes=2 * 1024 * 1024,
             vmem_limit_bytes=None,
             force_two_phase=False):
    """SELayer forward.

    x:     (B, C, H, W), NCHW like PyTorch.
    w_fc1: (C//r, C)  weight of fc[0] (out_features, in_features), no bias.
    w_fc2: (C, C//r)  weight of fc[2], no bias.
    returns (B, C, H, W).
    """
    B, C, H, W = x.shape
    HW = H * W
    Cr = w_fc1.shape[0]

    x_flat = x.reshape(B, C, HW)
    # PyTorch Linear computes y @ W.T; pre-transpose so kernels do y @ w.
    w1 = w_fc1.T  # (C, Cr)
    w2 = w_fc2.T  # (Cr, C)

    cap = _vmem_capacity_bytes()
    if vmem_limit_bytes is None:
        vmem_limit_bytes = min(int(cap * 0.75), 112 * 1024 * 1024)
    max_block_bytes = int(vmem_limit_bytes * 0.8)

    tb = None if force_two_phase else _choose_batch_tile(
        B, C, HW, x.dtype.itemsize, target_block_bytes, max_block_bytes)

    if tb is not None:
        # ---- Single fused pass: one read + one write of x. ----
        grid = (B // tb,)
        out_flat = pl.pallas_call(
            functools.partial(_se_fused_kernel, inv_hw=1.0 / HW),
            out_shape=jax.ShapeDtypeStruct((B, C, HW), x.dtype),
            grid_spec=pltpu.PrefetchScalarGridSpec(
                num_scalar_prefetch=0,
                grid=grid,
                in_specs=[
                    pl.BlockSpec((tb, C, HW), lambda b: (b, 0, 0)),
                    # Tiny weights: constant block index -> resident in VMEM.
                    pl.BlockSpec((C, Cr), lambda b: (0, 0)),
                    pl.BlockSpec((Cr, C), lambda b: (0, 0)),
                ],
                out_specs=pl.BlockSpec((tb, C, HW), lambda b: (b, 0, 0)),
            ),
            compiler_params=pltpu.CompilerParams(
                dimension_semantics=("parallel",),
                vmem_limit_bytes=vmem_limit_bytes,
            ),
        )(x_flat, w1, w2)
    else:
        # ---- Two-phase HW-tiled fallback (large feature maps). ----
        thw = _choose_hw_tile(C, HW, x.dtype.itemsize, target_block_bytes)
        n_hw = pl.cdiv(HW, thw)

        sums = pl.pallas_call(
            functools.partial(_squeeze_kernel, hw=HW, thw=thw),
            out_shape=jax.ShapeDtypeStruct((B, 1, C), jnp.float32),
            grid_spec=pltpu.PrefetchScalarGridSpec(
                num_scalar_prefetch=0,
                grid=(B, n_hw),
                in_specs=[pl.BlockSpec((1, C, thw), lambda b, t: (b, 0, t))],
                out_specs=pl.BlockSpec((1, 1, C), lambda b, t: (b, 0, 0)),
            ),
            compiler_params=pltpu.CompilerParams(
                dimension_semantics=("parallel", "arbitrary"),
                vmem_limit_bytes=vmem_limit_bytes,
            ),
        )(x_flat)

        # Tiny excite path in plain JAX (negligible vs. streaming x twice).
        y = sums.reshape(B, C) * (1.0 / HW)
        h = jnp.maximum(y @ w1, 0.0)
        gate = jax.nn.sigmoid(h @ w2).astype(x.dtype)                # (B, C)

        out_flat = pl.pallas_call(
            _scale_kernel,
            out_shape=jax.ShapeDtypeStruct((B, C, HW), x.dtype),
            grid_spec=pltpu.PrefetchScalarGridSpec(
                num_scalar_prefetch=0,
                grid=(B, n_hw),
                in_specs=[
                    pl.BlockSpec((1, C, thw), lambda b, t: (b, 0, t)),
                    pl.BlockSpec((1, C, 1), lambda b, t: (b, 0, 0)),
                ],
                out_specs=pl.BlockSpec((1, C, thw), lambda b, t: (b, 0, t)),
            ),
            compiler_params=pltpu.CompilerParams(
                dimension_semantics=("parallel", "parallel"),
                vmem_limit_bytes=vmem_limit_bytes,
            ),
        )(x_flat, gate.reshape(B, C, 1))

    return out_flat.reshape(B, C, H, W)


def se_layer_ref(x, w_fc1, w_fc2):
    """Pure-JAX reference matching the PyTorch module."""
    y = jnp.mean(x, axis=(2, 3))                 # AdaptiveAvgPool2d(1) + view(b, c)
    y = jnp.maximum(y @ w_fc1.T, 0.0)            # Linear(C, C//r, bias=False) + ReLU
    y = jax.nn.sigmoid(y @ w_fc2.T)              # Linear(C//r, C, bias=False) + Sigmoid
    return x * y[:, :, None, None]               # x * y.expand_as(x)


def _make_inputs(key, B, C, H, W, reduction):
    k_x, k_w1, k_w2 = jax.random.split(key, 3)
    Cr = max(1, C // reduction)
    x = jax.random.normal(k_x, (B, C, H, W), dtype=jnp.float32)
    w_fc1 = jax.random.normal(k_w1, (Cr, C), dtype=jnp.float32) * (1.0 / jnp.sqrt(C))
    w_fc2 = jax.random.normal(k_w2, (C, Cr), dtype=jnp.float32) * (1.0 / jnp.sqrt(Cr))
    return x, w_fc1, w_fc2


if __name__ == "__main__":
    key = jax.random.PRNGKey(0)
    k0, k1, k2 = jax.random.split(key, 3)

    # Test 1: lane-aligned spatial (HW = 256), fused path, >= 4 grid steps.
    x, w1, w2 = _make_inputs(k0, B=8, C=64, H=16, W=16, reduction=16)
    out = jax.block_until_ready(se_layer(x, w1, w2))
    ref = se_layer_ref(x, w1, w2)
    assert out.shape == x.shape
    assert jnp.allclose(out, ref, atol=1e-5, rtol=1e-5), "mismatch (fused aligned)"

    # Test 2: ragged spatial (7x7 = 49), fused path, no pad/slice round-trips.
    x2, w1_2, w2_2 = _make_inputs(k1, B=2, C=32, H=7, W=7, reduction=16)
    out2 = jax.block_until_ready(se_layer(x2, w1_2, w2_2))
    ref2 = se_layer_ref(x2, w1_2, w2_2)
    assert out2.shape == x2.shape
    assert jnp.allclose(out2, ref2, atol=1e-5, rtol=1e-5), "mismatch (fused ragged)"

    # Test 3: exercise the two-phase HW-tiled fallback (forced small tiles,
    # HW = 400 -> 128-wide tiles with a ragged tail).
    x3, w1_3, w2_3 = _make_inputs(k2, B=2, C=32, H=20, W=20, reduction=16)
    out3 = jax.block_until_ready(
        se_layer(x3, w1_3, w2_3, force_two_phase=True,
                 target_block_bytes=16 * 1024))
    ref3 = se_layer_ref(x3, w1_3, w2_3)
    assert out3.shape == x3.shape
    assert jnp.allclose(out3, ref3, atol=1e-5, rtol=1e-5), "mismatch (two-phase)"

    print("KERNEL_OK")
</pallas_src>

<mosaic_0001>
module attributes {stable_mosaic.version = 11 : i64} {
  func.func @_se_fused_kernel(%arg0: i32, %arg1: memref<2x64x256xf32, #tpu.memory_space<vmem>>, %arg2: memref<64x4xf32, #tpu.memory_space<vmem>>, %arg3: memref<4x64xf32, #tpu.memory_space<vmem>>, %arg4: memref<2x64x256xf32, #tpu.memory_space<vmem>>) attributes {dimension_semantics = [#tpu.dimension_semantics<parallel>], iteration_bounds = array<i64: 4>, scalar_prefetch = 0 : i64, scratch_operands = 0 : i64, tpu.core_type = #tpu.core_type<tc>, window_params = [{transform_indices = @transform_0, window_bounds = array<i64: 2, 64, 256>}, {pipeline_mode = #tpu.pipeline_mode<synchronous>, transform_indices = @transform_1, window_bounds = array<i64: 64, 4>}, {pipeline_mode = #tpu.pipeline_mode<synchronous>, transform_indices = @transform_2, window_bounds = array<i64: 4, 64>}, {transform_indices = @transform_3, window_bounds = array<i64: 2, 64, 256>}]} {
    %c0 = arith.constant 0 : index
    %c0_0 = arith.constant 0 : index
    %c0_1 = arith.constant 0 : index
    %0 = vector.load %arg1[%c0, %c0_0, %c0_1] : memref<2x64x256xf32, #tpu.memory_space<vmem>>, vector<2x64x256xf32>
    %cst = arith.constant dense<0.000000e+00> : vector<2x64xf32>
    %1 = vector.multi_reduction <add>, %0, %cst [2] : vector<2x64x256xf32> to vector<2x64xf32>
    %cst_2 = arith.constant 3.906250e-03 : f32
    %2 = vector.broadcast %cst_2 : f32 to vector<2x64xf32>
    %3 = arith.mulf %1, %2 : vector<2x64xf32>
    %c0_3 = arith.constant 0 : index
    %c0_4 = arith.constant 0 : index
    %4 = vector.load %arg2[%c0_3, %c0_4] : memref<64x4xf32, #tpu.memory_space<vmem>>, vector<64x4xf32>
    %cst_5 = arith.constant dense<0.000000e+00> : vector<2x4xf32>
    %5 = tpu.matmul %3, %4, %cst_5 {dimension_numbers = #tpu.dot_dimension_numbers<[1], [0], [0], [1], [0, 0, 1, 1], [], []>} : vector<2x64xf32>, vector<64x4xf32>, vector<2x4xf32> -> vector<2x4xf32>
    %cst_6 = arith.constant 0.000000e+00 : f32
    %6 = vector.broadcast %cst_6 : f32 to vector<2x4xf32>
    %7 = arith.maximumf %5, %6 : vector<2x4xf32>
    %c0_7 = arith.constant 0 : index
    %c0_8 = arith.constant 0 : index
    %8 = vector.load %arg3[%c0_7, %c0_8] : memref<4x64xf32, #tpu.memory_space<vmem>>, vector<4x64xf32>
    %cst_9 = arith.constant dense<0.000000e+00> : vector<2x64xf32>
    %9 = tpu.matmul %7, %8, %cst_9 {dimension_numbers = #tpu.dot_dimension_numbers<[1], [0], [0], [1], [0, 0, 1, 1], [], []>} : vector<2x4xf32>, vector<4x64xf32>, vector<2x64xf32> -> vector<2x64xf32>
    %10 = arith.negf %9 : vector<2x64xf32>
    %11 = math.exp %10 : vector<2x64xf32>
    %cst_10 = arith.constant 1.000000e+00 : f32
    %12 = vector.broadcast %cst_10 : f32 to vector<2x64xf32>
    %13 = arith.addf %12, %11 : vector<2x64xf32>
    %14 = arith.divf %12, %13 : vector<2x64xf32>
    %15 = vector.shape_cast %14 : vector<2x64xf32> to vector<2x64x1xf32>
    %16 = vector.broadcast %15 : vector<2x64x1xf32> to vector<2x64x256xf32>
    %17 = arith.mulf %0, %16 : vector<2x64x256xf32>
    %c0_11 = arith.constant 0 : index
    %c0_12 = arith.constant 0 : index
    %c0_13 = arith.constant 0 : index
    %18 = vector.load %arg4[%c0_11, %c0_12, %c0_13] : memref<2x64x256xf32, #tpu.memory_space<vmem>>, vector<2x64x256xf32>
    tpu.vector_store %arg4[%c0_11, %c0_12, %c0_13], %17 {strides = array<i32>} : memref<2x64x256xf32, #tpu.memory_space<vmem>>, vector<2x64x256xf32>,
    return
  }
  func.func @transform_0(%arg0: i32) -> (i32, i32, i32) {
    %c0_i32 = arith.constant 0 : i32
    %c0_i32_0 = arith.constant 0 : i32
    %c0_i32_1 = arith.constant 0 : i32
    return %arg0, %c0_i32, %c0_i32_0 : i32, i32, i32
  }
  func.func @transform_1(%arg0: i32) -> (i32, i32) {
    %c0_i32 = arith.constant 0 : i32
    %c0_i32_0 = arith.constant 0 : i32
    %c0_i32_1 = arith.constant 0 : i32
    return %c0_i32, %c0_i32_0 : i32, i32
  }
  func.func @transform_2(%arg0: i32) -> (i32, i32) {
    %c0_i32 = arith.constant 0 : i32
    %c0_i32_0 = arith.constant 0 : i32
    %c0_i32_1 = arith.constant 0 : i32
    return %c0_i32, %c0_i32_0 : i32, i32
  }
  func.func @transform_3(%arg0: i32) -> (i32, i32, i32) {
    %c0_i32 = arith.constant 0 : i32
    %c0_i32_0 = arith.constant 0 : i32
    %c0_i32_1 = arith.constant 0 : i32
    return %arg0, %c0_i32, %c0_i32_0 : i32, i32, i32
  }
}

</mosaic_0001>

<bundles_post_ra>
// kernel: tpu_custom_call.1
= control target key start
LH: loop header
LB: loop body
LE: loop exit
PB: predicated region body
PF: predicated region fallthrough
CT: control target
= control target key end

     0   :  { %8 = vsyncpa [#allocation3], 0  ;;  %s1456_s0 = inlined_call_operand.hbm [shape: f32[8,64,256], index: 0, kind: input, shape index: {}]   ;;  %s1457_s1 = inlined_call_operand.vmem [shape: f32[64,4], index: 1, kind: input, shape index: {}]   ;;  %s1458_s2 = inlined_call_operand.vmem [shape: f32[4,64], index: 2, kind: input, shape index: {}]   ;;  %s1459_s3 = inlined_call_operand.hbm [shape: f32[8,64,256], index: 3, kind: output, shape index: {}]  }
   0x1   :  { %10 = vsyncpa [#allocation3 + $0x1], 0 }
   0x2   :  { %11 = vsyncpa [#allocation4], 0 }
   0x3   :  { %13 = vsyncpa [#allocation4 + $0x1], 0  ;;  %s1044_s12 = smov 0   ;;  %s1046_s13 = smov 0  }
   0x4   :  { %s1048_s14 = smov 0   ;;  %s1050_s15 = smov 0  }
   0x5 LB: > { %s1065_s16 = sadd.s32 4294967295, %s1013_s15   ;;  %s789_s17 = sadd.s32 4294967294, %s1013_s15   ;;  %s1013_s15 = sphi %s1050_s15, %s1492_s15   ;;  %s1009_s14 = sphi %s1048_s14, %s1491_s14   ;;  %s1005_s13 = sphi %s1046_s13, %s1490_s13   ;;  %s1001_s12 = sphi %s1044_s12, %s1489_s12  }
   0x6   : > { %s1069_s18 = sadd.s32 1, %s1013_s15   ;;  %s26_s19 = sadd.s32 1, %s1009_s14 }
   0x7   : > { %s23_s20 = ssub.s32 %s1013_s15, %s1069_s18  ;;  %p33_p0 = scmp.ne.s32.totalorder %s1009_s14, %s1005_s13 }
   0x8   : > { %p24_p1 = scmp.eq.s32.totalorder %s23_s20, 0  ;;  %p34_p2 = scmp.eq.s32.totalorder %s1013_s15, 0 }
   0x9   : > { %p39_p3 = scmp.ne.s32.totalorder %s1005_s13, %s1001_s12  ;;  %p40_p4 = scmp.eq.s32.totalorder %s1065_s16, 0 }
   0xa   : > { %s1081_s21 = scalar_select %p24_p1, %s1009_s14, %s26_s19  }
   0xb   : > { %p1083_p5 = por %p34_p2, %p33_p0  ;;  %p1087_p6 = por %p40_p4, %p39_p3 }
   0xc   : > { %p105_p7 = scmp.eq.s32.totalorder %s1065_s16, 3  ;;  %p111_p8 = scmp.eq.s32.totalorder %s789_s17, 3 }
   0xd   : > { %p872_p9 = scmp.lt.s32.totalorder %s1013_s15, 4  ;;  %s137_s26 = sand.u32 1, %s1009_s14  }
   0xe   : > { %p1093_p10 = por %p105_p7, %p33_p0  ;;  %p1097_p11 = por %p111_p8, %p39_p3 }
   0xf   : > { %s810_s27 = sshll.u32 %s1013_s15, 12  ;;  %s792_s28 = sshll.u32 %s137_s26, 8 }
  0x10   : > { %s1470_s24 = scalar_select %p1093_p10, 1, 0 }
  0x11   : > { %s1471_s25 = scalar_select %p1097_p11, 1, 0 }
  0x12   : > { %s1106_s4 = scalar_lea.hbm %s1456_s0, %s810_s27  ;;  %s141_s5 = scalar_lea.vmem [#allocation2], %s792_s28 }
  0x13   : > { %s149_s6 = sshll.u32 %s141_s5, 4  ;;  %p1110_p12 = pnand %p872_p9, %p1083_p5  ;;  %s1114_s6 = int_to_ptr.vmem [resolvable:$true] %s149_s6 }
  0x14   : > { %s1116_s8 = scalar_lea.sflag [#allocation3], %s137_s26  ;;  %s917_s9 = scalar_lea.hbm %s1106_s4, 4096 }
  0x15   : > { %p918_p13 = scmp.ne.s32.totalorder %s1106_s4, %s917_s9  ;;  %p919_p0 = pneg %p1110_p12 }
  0x16   : > { %s922_s17 = scalar_lea.hbm %s1456_s0, 16384  ;;  %p923_p3 = scmp.lt.u32.totalorder %s1106_s4, %s1456_s0 }
  0x17   : > { %p920_p1 = pnand %p919_p0, %p918_p13  ;;  %p924_p4 = scmp.lt.u32.totalorder %s922_s17, %s917_s9 }
  0x18   : > { %p926_p7 = scmp.lt.u32.totalorder %s917_s9, %s1106_s4 }
  0x19   : > { %p921_p2 = pneg %p920_p1  ;;  %p925_p5 = por %p924_p4, %p923_p3 }
  0x1b   : > { %p927_p8 = por %p926_p7, %p925_p5 }
  0x1d   : > { %p928_p9 = pnand %p927_p8, %p921_p2 }
  0x1f   : > { %931 = shalt.err (!%p928_p9)
}
  0x20   : > { %s932_s22 = scalar_lea.vmem %s1114_s6, 4096  ;;  %s1015_s26 = smov [#allocation2]  }
  0x21   : > { %p933_p13 = scmp.ne.s32.totalorder %s1114_s6, %s932_s22  ;;  %s937_s27 = sshll.u32 %s1015_s26, 4  ;;  %s938_s27 = int_to_ptr.vmem [resolvable:$false] %s937_s27 }
  0x22   : > { %s939_s28 = scalar_lea.vmem %s938_s27, 8192  ;;  %p940_p10 = scmp.lt.s32.totalorder %s1114_s6, %s938_s27 }
  0x23   : > { %p935_p1 = pnand %p933_p13, %p919_p0  ;;  %p941_p3 = scmp.lt.s32.totalorder %s939_s28, %s932_s22 }
  0x25   : > { %p936_p11 = pneg %p935_p1  ;;  %p942_p4 = por %p941_p3, %p940_p10 }
  0x27   : > { %p943_p5 = pnand %p942_p4, %p936_p11 }
  0x29   : > { %946 = shalt.err (!%p943_p5)
}
  0x2a   : > { %s1016_s29 = smov 256   ;;  %s1017_s30 = smov 16  }
  0x2b   : > { %867 = dma.hbm_to_vmem [thread:$0]  (!%p1110_p12), %s1106_s4, 4096, %s1114_s6, %s1116_s8, %s1016_s29, %s1016_s29, %s1017_s30  }
  0x2c   : > { %p796_p0 = scmp.ge.s32.totalorder %s1013_s15, 1  ;;  %p157_p2 = scmp.lt.s32.totalorder %s1013_s15, 5 }
  0x2e   : > { %p158_p7 = pnand %p796_p0, %p157_p2 }
  0x30   : > { %161 = sbr.rel (%p158_p7) target bundleno = 857 (0x359), region = 32 }
  0x37   : > { %s1147_s5 = sand.u32 1, %s1005_s13  }
  0x38   : > { %s797_s9 = sshll.u32 %s1147_s5, 8  ;;  %s164_s10 = scalar_lea.sflag [#allocation3], %s1147_s5 }
  0x39   : > { %s1153_s11 = scalar_lea.vmem [#allocation2], %s797_s9 }
  0x3a   : > { %992 = dma.done.wait (%p1087_p6), %s164_s10, 4096  }
  0x3b   : > { %994 = vsyncadd (%p1087_p6), %s164_s10, 4294963200  ;;  %v1160_v0 = vld [vmem:[%s1153_s11 + $0x80] sm:$0xff]  ;;  %v1163_v1 = vld [vmem:[%s1153_s11 + $0x88] sm:$0xff]  ;;  %v1018_v51 = vmov 0.0|0.0   ;;  %vm1019_vm0 = vmmov 0   ;;  %v1020_v61 = vmov 0.0  }
  0x3c   : > { %v1166_v2 = vld [vmem:[%s1153_s11] sm:$0xff]  ;;  %v248_v3 = vadd.f32 %v1163_v1, %v1160_v0  ;;  %v1171_v4 = vld [vmem:[%s1153_s11 + $0x8] sm:$0xff]  ;;  %v1174_v5 = vld [vmem:[%s1153_s11 + $0x90] sm:$0xff]  ;;  %848 = vmatprep.subr.bf16.mxu0 %v1018_v51  ;;  %840 = vmatprep.mubr.msk.f32.mxu0 %vm1019_vm0, %v1020_v61  ;;  %vm323_vm1 = vcmask 130112   ;;  %vm330_vm2 = vcmask 195712   ;;  %vm337_vm3 = vcmask 261312  }
  0x3d   : > { %v1177_v6 = vld [vmem:[%s1153_s11 + $0x98] sm:$0xff]  ;;  %v224_v7 = vadd.f32 %v1171_v4, %v1166_v2  ;;  %v1182_v8 = vld [vmem:[%s1153_s11 + $0x10] sm:$0xff]  ;;  %v1192_v12 = vld [vmem:[%s1153_s11 + $0xa0] sm:$0xff]  ;;  %843 = vmatprep.subr.mxu1 %v1020_v61  ;;  %845 = vmatprep.mubr.msk.f32.mxu1 %vm1019_vm0, %v1020_v61  ;;  %vm344_vm4 = vcmask 326912   ;;  %vm351_vm5 = vcmask 392512   ;;  %vm358_vm6 = vcmask 458112  }
  0x3e   : > { %v1185_v9 = vld [vmem:[%s1153_s11 + $0x18] sm:$0xff]  ;;  %249 = vadd.xlane.f32.xlu1 %v248_v3  ;;  %v251_v10 = vadd.f32 %v1177_v6, %v1174_v5  ;;  %v1195_v13 = vld [vmem:[%s1153_s11 + $0xa8] sm:$0xff]  ;;  %v1198_v14 = vld [vmem:[%s1153_s11 + $0x20] sm:$0xff]  ;;  %vm365_vm7 = vcmask 523712   ;;  %vm406_vm8 = vcmask 1041409   ;;  %vm408_vm9 = vcmask 523264  }
  0x3f   : > { %225 = vadd.xlane.f32.xlu0 %v224_v7  ;;  %v227_v11 = vadd.f32 %v1185_v9, %v1182_v8  ;;  %v1201_v15 = vld [vmem:[%s1153_s11 + $0x28] sm:$0xff]  ;;  %v254_v16 = vadd.f32 %v1195_v13, %v1192_v12  ;;  %v1208_v18 = vld [vmem:[%s1153_s11 + $0xb0] sm:$0xff]  ;;  %v1211_v19 = vld [vmem:[%s1153_s11 + $0xb8] sm:$0xff]  ;;  %vm487_vm10 = vcmask 1043456   ;;  %vm483_vm11 = vcmask 31744   ;;  %s1344_s6 = scalar_lea.vmem [#allocation5], %s797_s9 }
  0x40   : > { %v230_v17 = vadd.f32 %v1201_v15, %v1198_v14  ;;  %1473 = vst [vmem:[#allocation8_spill] sm:$0xff] %v1211_v19  ;;  %v1214_v20 = vld [vmem:[%s1153_s11 + $0x30] sm:$0xff]  ;;  %v1217_v21 = vld [vmem:[%s1153_s11 + $0x38] sm:$0xff]  ;;  %v257_v22 = vadd.f32 %v1211_v19, %v1208_v18  ;;  %v1224_v24 = vld [vmem:[%s1153_s11 + $0xc0] sm:$0xff]  ;;  %s812_s9 = sshll.u32 %s1065_s16, 12  ;;  %s716_s7 = sshll.u32 %s1344_s6, 4  ;;  %s1409_s7 = int_to_ptr.vmem [resolvable:$true] %s716_s7 }
  0x41   : > { %v233_v23 = vadd.f32 %v1217_v21, %v1214_v20  ;;  %v1227_v25 = vld [vmem:[%s1153_s11 + $0xc8] sm:$0xff]  ;;  %v1230_v26 = vld [vmem:[%s1153_s11 + $0x40] sm:$0xff]  ;;  %v1240_v30 = vld [vmem:[%s1153_s11 + $0xd0] sm:$0xff]  ;;  %s1407_s19 = scalar_lea.hbm %s1459_s3, %s812_s9  ;;  %s702_s16 = scalar_lea.sflag [#allocation4], %s1147_s5 }
  0x42   : > { %252 = vadd.xlane.f32.xlu1 %v251_v10  ;;  %v1233_v27 = vld [vmem:[%s1153_s11 + $0x48] sm:$0xff]  ;;  %v260_v28 = vadd.f32 %v1227_v25, %v1224_v24  ;;  %1474 = vst [vmem:[#allocation9_spill] sm:$0xff] %v1240_v30  ;;  %v1243_v31 = vld [vmem:[%s1153_s11 + $0xd8] sm:$0xff]  ;;  %v1246_v32 = vld [vmem:[%s1153_s11 + $0x50] sm:$0xff]  ;;  %v312_v10 = vlaneseq  ;;  %s947_s20 = scalar_lea.vmem %s1409_s7, 4096  ;;  %p1487_p10 = scmp.ne.s32.totalorder %s1470_s24, 0 }
  0x43   : > { %228 = vadd.xlane.f32.xlu0 %v227_v11  ;;  %v236_v29 = vadd.f32 %v1233_v27, %v1230_v26  ;;  %1475 = vst [vmem:[#allocation10_spill] sm:$0xff] %v1243_v31  ;;  %v1249_v33 = vld [vmem:[%s1153_s11 + $0x58] sm:$0xff]  ;;  %v263_v34 = vadd.f32 %v1243_v31, %v1240_v30  ;;  %v1256_v36 = vld [vmem:[%s1153_s11 + $0xe0] sm:$0xff]  ;;  %v1259_v37 = vld [vmem:[%s1153_s11 + $0xe8] sm:$0xff]  ;;  %p948_p6 = scmp.ne.s32.totalorder %s1409_s7, %s947_s20  ;;  %s1021_s22 = smov [#allocation5]  }
  0x44   : > { %v239_v35 = vadd.f32 %v1249_v33, %v1246_v32  ;;  %1476 = vst [vmem:[#allocation11_spill] sm:$0xff] %v1256_v36  ;;  %1477 = vst [vmem:[#allocation12_spill] sm:$0xff] %v1259_v37  ;;  %v1262_v38 = vld [vmem:[%s1153_s11 + $0x60] sm:$0xff]  ;;  %v1265_v39 = vld [vmem:[%s1153_s11 + $0x68] sm:$0xff]  ;;  %v266_v40 = vadd.f32 %v1259_v37, %v1256_v36  ;;  %s951_s26 = sshll.u32 %s1021_s22, 4  ;;  %s952_s26 = int_to_ptr.vmem [resolvable:$false] %s951_s26 }
  0x45   : > { %v242_v41 = vadd.f32 %v1265_v39, %v1262_v38  ;;  %v1272_v42 = vld [vmem:[%s1153_s11 + $0xf0] sm:$0xff]  ;;  %v1275_v43 = vld [vmem:[%s1153_s11 + $0xf8] sm:$0xff]  ;;  %v288_v48 = vld [vmem:[%s1457_s1] sm:$0xff]  ;;  %p949_p11 = pnand %p948_p6, %p1487_p10  ;;  %s953_s27 = scalar_lea.vmem %s952_s26, 8192 }
  0x46   : > { %255 = vadd.xlane.f32.xlu1 %v254_v16  ;;  %1478 = vst [vmem:[#allocation13_spill] sm:$0xff] %v1272_v42  ;;  %1479 = vst [vmem:[#allocation14_spill] sm:$0xff] %v1275_v43  ;;  %v1278_v44 = vld [vmem:[%s1153_s11 + $0x70] sm:$0xff]  ;;  %v1281_v45 = vld [vmem:[%s1153_s11 + $0x78] sm:$0xff]  ;;  %v269_v46 = vadd.f32 %v1275_v43, %v1272_v42  ;;  %p954_p8 = scmp.lt.s32.totalorder %s1409_s7, %s952_s26  ;;  %p955_p9 = scmp.lt.s32.totalorder %s953_s27, %s947_s20 }
  0x47   : > { %231 = vadd.xlane.f32.xlu0 %v230_v17  ;;  %v245_v47 = vadd.f32 %v1281_v45, %v1278_v44  ;;  %v289_v49 = vld [vmem:[%s1457_s1 + $0x8] sm:$0xff]  ;;  %v290_v52 = vld [vmem:[%s1457_s1 + $0x10] sm:$0xff]  ;;  %v291_v53 = vld [vmem:[%s1457_s1 + $0x18] sm:$0xff]  ;;  %v313_v17 = vand.u32 127, %v312_v10  ;;  %p950_p12 = pneg %p949_p11 }
  0x48   : > { %v849_v50 = vpack.c.bf16 %v289_v49, %v288_v48  ;;  %v852_v54 = vpack.c.bf16 %v291_v53, %v290_v52  ;;  %v292_v55 = vld [vmem:[%s1457_s1 + $0x20] sm:$0xff]  ;;  %v293_v56 = vld [vmem:[%s1457_s1 + $0x28] sm:$0xff]  ;;  %v294_v58 = vld [vmem:[%s1457_s1 + $0x30] sm:$0xff]  ;;  %p956_p13 = por %p955_p9, %p954_p8 }
  0x49   : > { %v855_v57 = vpack.c.bf16 %v293_v56, %v292_v55  ;;  %v295_v59 = vld [vmem:[%s1457_s1 + $0x38] sm:$0xff] }
  0x4a   : > { %258 = vadd.xlane.f32.xlu1 %v257_v22  ;;  %850 = vmatpush3.bf16.msra.mxu0 %v849_v50  ;;  %v858_v60 = vpack.c.bf16 %v295_v59, %v294_v58  ;;  %p957_p1 = pnand %p956_p13, %p950_p12 }
  0x4b   : > { %234 = vadd.xlane.f32.xlu0 %v233_v23  ;;  %851 = vmatprep.subr.bf16.mxu0 %v1018_v51  ;;  %v1311_v23 = vshrl.u32 %v312_v10, 7 }
  0x4e   : > { %261 = vadd.xlane.f32.xlu1 %v260_v28  ;;  %853 = vmatpush3.bf16.msra.mxu0 %v852_v54 }
  0x4f   : > { %237 = vadd.xlane.f32.xlu0 %v236_v29  ;;  %854 = vmatprep.subr.bf16.mxu0 %v1018_v51  ;;  %v318_v29 = vadd.s32 4294967288, %v313_v17 }
  0x51   : > { %v321_v49 = vsub.s32 %v318_v29, %v1311_v23 }
  0x52   : > { %264 = vadd.xlane.f32.xlu1 %v263_v34  ;;  %856 = vmatpush3.bf16.msra.mxu0 %v855_v57  ;;  %v325_v34 = vadd.s32 4294967280, %v313_v17 }
  0x53   : > { %240 = vadd.xlane.f32.xlu0 %v239_v35  ;;  %857 = vmatprep.subr.bf16.mxu0 %v1018_v51  ;;  %v332_v35 = vadd.s32 4294967272, %v313_v17  ;;  %v353_v51 = vadd.s32 4294967248, %v313_v17 }
  0x54   : > { %v328_v50 = vsub.s32 %v325_v34, %v1311_v23 }
  0x55   : > { %v335_v53 = vsub.s32 %v332_v35, %v1311_v23 }
  0x56   : > { %267 = vadd.xlane.f32.xlu1 %v266_v40  ;;  %859 = vmatpush3.bf16.msra.mxu0 %v858_v60  ;;  %v339_v40 = vadd.s32 4294967264, %v313_v17 }
  0x57   : > { %243 = vadd.xlane.f32.xlu0 %v242_v41 }
  0x58   : > { %v342_v54 = vsub.s32 %v339_v40, %v1311_v23  ;;  %v360_v40 = vadd.s32 4294967240, %v313_v17 }
  0x5a   : > { %270 = vadd.xlane.f32.xlu1 %v269_v46  ;;  %v346_v46 = vadd.s32 4294967256, %v313_v17 }
  0x5b   : > { %246 = vadd.xlane.f32.xlu0 %v245_v47  ;;  %v316_v47 = vsub.s32 %v313_v17, %v1311_v23  ;;  %v363_v17 = vsub.s32 %v360_v40, %v1311_v23 }
  0x5c   : > { %v349_v57 = vsub.s32 %v346_v46, %v1311_v23 }
  0xcb   : > { %v250_v62 = vpop.xlane.xlu1 %249 }
  0xcc   : > { %v226_v63 = vpop.xlane.xlu0 %225  ;;  %v280_v59 = vmul.f32 0.00390625, %v250_v62 }
  0xcd   : > { %v272_v29 = vmul.f32 0.00390625, %v226_v63 }
  0xce   : > { %v370_v37 = vrot.slane %v280_v59, %v316_v47 }
  0xcf   : > { %v253_v3 = vpop.xlane.xlu1 %252  ;;  %v317_v19 = vrot.slane %v272_v29, %v316_v47 }
  0xd0   : > { %v229_v7 = vpop.xlane.xlu0 %228  ;;  %v281_v52 = vmul.f32 0.00390625, %v253_v3  ;;  %v356_v3 = vsub.s32 %v353_v51, %v1311_v23 }
  0xd1   : > { %v273_v55 = vmul.f32 0.00390625, %v229_v7 }
  0xd2   : > { %v374_v35 = vrot.slane %v281_v52, %v321_v49 }
  0xd3   : > { %v256_v11 = vpop.xlane.xlu1 %255  ;;  %v322_v7 = vrot.slane %v273_v55, %v321_v49 }
  0xd4   : > { %v232_v16 = vpop.xlane.xlu0 %231  ;;  %v282_v56 = vmul.f32 0.00390625, %v256_v11  ;;  %v375_v51 = vsel %vm323_vm1, %v374_v35, %v370_v37  ;;  %v482_v35 = vld [vmem:[%s1458_s2] sm:$0xf] }
  0xd5   : > { %v274_v60 = vmul.f32 0.00390625, %v232_v16  ;;  %v324_v49 = vsel %vm323_vm1, %v322_v7, %v317_v19  ;;  %844 = vmatpush3.msk.msra.mxu1 %vm487_vm10, %v482_v35 }
  0xd6   : > { %v379_v11 = vrot.slane %v282_v56, %v328_v50 }
  0xd7   : > { %v259_v22 = vpop.xlane.xlu1 %258  ;;  %v329_v62 = vrot.slane %v274_v60, %v328_v50 }
  0xd8   : > { %v235_v28 = vpop.xlane.xlu0 %234  ;;  %v283_v61 = vmul.f32 0.00390625, %v259_v22  ;;  %v380_v55 = vsel %vm330_vm2, %v379_v11, %v375_v51 }
  0xd9   : > { %v275_v34 = vmul.f32 0.00390625, %v235_v28  ;;  %v331_v59 = vsel %vm330_vm2, %v329_v62, %v324_v49 }
  0xda   : > { %v384_v16 = vrot.slane %v283_v61, %v335_v53 }
  0xdb   : > { %v262_v41 = vpop.xlane.xlu1 %261  ;;  %v336_v63 = vrot.slane %v275_v34, %v335_v53 }
  0xdc   : > { %v238_v48 = vpop.xlane.xlu0 %237  ;;  %v284_v43 = vmul.f32 0.00390625, %v262_v41  ;;  %v385_v47 = vsel %vm337_vm3, %v384_v16, %v380_v55 }
  0xdd   : > { %v276_v42 = vmul.f32 0.00390625, %v238_v48  ;;  %v338_v37 = vsel %vm337_vm3, %v336_v63, %v331_v59 }
  0xde   : > { %v389_v28 = vrot.slane %v284_v43, %v342_v54 }
  0xdf   : > { %v265_v58 = vpop.xlane.xlu1 %264  ;;  %v343_v52 = vrot.slane %v276_v42, %v342_v54 }
  0xe0   : > { %v241_v10 = vpop.xlane.xlu0 %240  ;;  %v285_v31 = vmul.f32 0.00390625, %v265_v58 }
  0xe1   : > { %v277_v30 = vmul.f32 0.00390625, %v241_v10  ;;  %v345_v19 = vsel %vm344_vm4, %v343_v52, %v338_v37  ;;  %v604_v52 = vsub.s32 1, %v1311_v23 }
  0xe2   : > { %v394_v48 = vrot.slane %v285_v31, %v349_v57  ;;  %v390_v31 = vsel %vm344_vm4, %v389_v28, %v385_v47  ;;  %v569_v28 = vsub.s32 0, %v1311_v23 }
  0xe3   : > { %v268_v46 = vpop.xlane.xlu1 %267  ;;  %v350_v56 = vrot.slane %v277_v30, %v349_v57 }
  0xe4   : > { %v286_v22 = vmul.f32 0.00390625, %v268_v46  ;;  %v244_v36 = vpop.xlane.xlu0 %243  ;;  %v395_v54 = vsel %vm351_vm5, %v394_v48, %v390_v31 }
  0xe5   : > { %v278_v41 = vmul.f32 0.00390625, %v244_v36  ;;  %v352_v57 = vsel %vm351_vm5, %v350_v56, %v345_v19 }
  0xe6   : > { %v399_v58 = vrot.slane %v286_v22, %v356_v3 }
  0xe7   : > { %v271_v50 = vpop.xlane.xlu1 %270  ;;  %v357_v53 = vrot.slane %v278_v41, %v356_v3 }
  0xe8   : > { %v287_v43 = vmul.f32 0.00390625, %v271_v50  ;;  %v247_v36 = vpop.xlane.xlu0 %246  ;;  %v400_v60 = vsel %vm358_vm6, %v399_v58, %v395_v54 }
  0xe9   : > { %v279_v42 = vmul.f32 0.00390625, %v247_v36  ;;  %v359_v10 = vsel %vm358_vm6, %v357_v53, %v352_v57  ;;  %v1480_v57 = vld [vmem:[#allocation8_spill] sm:$0xff] }
  0xea   : > { %v404_v30 = vrot.slane %v287_v43, %v363_v17 }
  0xeb   : > { %v364_v61 = vrot.slane %v279_v42, %v363_v17 }
  0xec   : > { %v405_v29 = vsel %vm365_vm7, %v404_v30, %v400_v60 }
  0xed   : > { %v366_v34 = vsel %vm365_vm7, %v364_v61, %v359_v10  ;;  %v1482_v10 = vld [vmem:[#allocation12_spill] sm:$0xff] }
  0xee   : > { %v407_v3 = vsel %vm406_vm8, %v405_v29, %v366_v34  ;;  %v1483_v29 = vld [vmem:[#allocation9_spill] sm:$0xff] }
  0xef   : > { %841 = vmatmul.mubr.msk.f32.vlgmr.msra.gmra.mrb[0].mxu0 %vm408_vm9, %v407_v3  ;;  %v1484_v3 = vld [vmem:[#allocation10_spill] sm:$0xff] }
 0x1c2   : > { %v477_v40 = vpop.f32.mrb[0].mxu0 }
 0x1c3   : > { %v481_v7 = vmax.f32 %v477_v40, 0.0  ;;  %v842_v11 = vpop.f32.mrb[1].mxu0  ;;  %v1485_v40 = vld [vmem:[#allocation13_spill] sm:$0xff] }
 0x1c4   : > { %v1486_v11 = vld [vmem:[#allocation14_spill] sm:$0xff] }
 0x1c5   : > { %846 = vmatmul.mubr.msk.f32.vlgmr.msra.gmra.mrb[0].mxu1 %vm483_vm11, %v481_v7 }
 0x298   : > { %v557_v46 = vpop.f32.mrb[0].mxu1 }
 0x299   : > { %v802_v62 = vmul.f32 -1.442695, %v557_v46  ;;  %v847_v16 = vpop.f32.mrb[1].mxu1 }
 0x29b   : > { %913 = vpow2.f32 %v802_v62 }
 0x2a5   : > { %v914_v22 = vpop.eup %913 }
 0x2a6   : > { %v564_v63 = vadd.f32 1.0, %v914_v22 }
 0x2a8   : > { %915 = vrcp.f32 %v564_v63 }
 0x2b2   : > { %v916_v41 = vpop.eup %915 }
 0x2b3   : > { %v570_v51 = vrot.slane %v916_v41, %v569_v28  ;;  %v605_v48 = vrot.slane %v916_v41, %v604_v52 }
 0x2b5   : > { %576 = vbcast.lane.b32.xlu1 %v570_v51, 264  ;;  %572 = vbcast.lane.b32.xlu0 %v570_v51, 256 }
 0x2b9   : > { %580 = vbcast.lane.b32.xlu1 %v570_v51, 272  ;;  %588 = vbcast.lane.b32.xlu0 %v570_v51, 288 }
 0x2bd   : > { %584 = vbcast.lane.b32.xlu1 %v570_v51, 280  ;;  %596 = vbcast.lane.b32.xlu0 %v570_v51, 304 }
 0x2c1   : > { %592 = vbcast.lane.b32.xlu1 %v570_v51, 296  ;;  %607 = vbcast.lane.b32.xlu0 %v605_v48, 256 }
 0x2c5   : > { %600 = vbcast.lane.b32.xlu1 %v570_v51, 312  ;;  %615 = vbcast.lane.b32.xlu0 %v605_v48, 272 }
 0x2c9   : > { %611 = vbcast.lane.b32.xlu1 %v605_v48, 264  ;;  %623 = vbcast.lane.b32.xlu0 %v605_v48, 288 }
 0x2cd   : > { %619 = vbcast.lane.b32.xlu1 %v605_v48, 280  ;;  %631 = vbcast.lane.b32.xlu0 %v605_v48, 304 }
 0x2d1   : > { %627 = vbcast.lane.b32.xlu1 %v605_v48, 296 }
 0x2d5   : > { %635 = vbcast.lane.b32.xlu1 %v605_v48, 312 }
 0x327   : > { %v577_v17 = vpop.permute.xlu1 %576  ;;  %v573_v49 = vpop.permute.xlu0 %572 }
 0x328   : > { %v639_v55 = vmul.f32 %v577_v17, %v1182_v8  ;;  %v640_v23 = vmul.f32 %v577_v17, %v1185_v9  ;;  %v637_v56 = vmul.f32 %v573_v49, %v1166_v2  ;;  %v638_v58 = vmul.f32 %v573_v49, %v1171_v4 }
 0x32a   : > { %671 = vst [vmem:[%s1344_s6 + $0x10] sm:$0xff] %v639_v55  ;;  %672 = vst [vmem:[%s1344_s6 + $0x18] sm:$0xff] %v640_v23 }
 0x32b   : > { %669 = vst [vmem:[%s1344_s6] sm:$0xff] %v637_v56  ;;  %670 = vst [vmem:[%s1344_s6 + $0x8] sm:$0xff] %v638_v58  ;;  %v581_v8 = vpop.permute.xlu1 %580  ;;  %v589_v2 = vpop.permute.xlu0 %588 }
 0x32c   : > { %v641_v4 = vmul.f32 %v581_v8, %v1198_v14  ;;  %v642_v9 = vmul.f32 %v581_v8, %v1201_v15  ;;  %v645_v50 = vmul.f32 %v589_v2, %v1230_v26  ;;  %v646_v59 = vmul.f32 %v589_v2, %v1233_v27 }
 0x32e   : > { %673 = vst [vmem:[%s1344_s6 + $0x20] sm:$0xff] %v641_v4  ;;  %674 = vst [vmem:[%s1344_s6 + $0x28] sm:$0xff] %v642_v9 }
 0x32f   : > { %677 = vst [vmem:[%s1344_s6 + $0x40] sm:$0xff] %v645_v50  ;;  %678 = vst [vmem:[%s1344_s6 + $0x48] sm:$0xff] %v646_v59  ;;  %v585_v47 = vpop.permute.xlu1 %584  ;;  %v597_v53 = vpop.permute.xlu0 %596 }
 0x330   : > { %v643_v43 = vmul.f32 %v585_v47, %v1214_v20  ;;  %v644_v14 = vmul.f32 %v585_v47, %v1217_v21  ;;  %v649_v15 = vmul.f32 %v597_v53, %v1262_v38  ;;  %v650_v26 = vmul.f32 %v597_v53, %v1265_v39 }
 0x332   : > { %675 = vst [vmem:[%s1344_s6 + $0x30] sm:$0xff] %v643_v43  ;;  %676 = vst [vmem:[%s1344_s6 + $0x38] sm:$0xff] %v644_v14 }
 0x333   : > { %681 = vst [vmem:[%s1344_s6 + $0x60] sm:$0xff] %v649_v15  ;;  %682 = vst [vmem:[%s1344_s6 + $0x68] sm:$0xff] %v650_v26  ;;  %v593_v27 = vpop.permute.xlu1 %592  ;;  %v608_v36 = vpop.permute.xlu0 %607 }
 0x334   : > { %v647_v37 = vmul.f32 %v593_v27, %v1246_v32  ;;  %v648_v20 = vmul.f32 %v593_v27, %v1249_v33  ;;  %v653_v21 = vmul.f32 %v608_v36, %v1160_v0  ;;  %v654_v38 = vmul.f32 %v608_v36, %v1163_v1 }
 0x336   : > { %679 = vst [vmem:[%s1344_s6 + $0x50] sm:$0xff] %v647_v37  ;;  %680 = vst [vmem:[%s1344_s6 + $0x58] sm:$0xff] %v648_v20 }
 0x337   : > { %685 = vst [vmem:[%s1344_s6 + $0x80] sm:$0xff] %v653_v21  ;;  %686 = vst [vmem:[%s1344_s6 + $0x88] sm:$0xff] %v654_v38  ;;  %v601_v39 = vpop.permute.xlu1 %600  ;;  %v616_v31 = vpop.permute.xlu0 %615 }
 0x338   : > { %v651_v42 = vmul.f32 %v601_v39, %v1278_v44  ;;  %v652_v32 = vmul.f32 %v601_v39, %v1281_v45  ;;  %v657_v33 = vmul.f32 %v616_v31, %v1192_v12  ;;  %v658_v0 = vmul.f32 %v616_v31, %v1195_v13 }
 0x33a   : > { %683 = vst [vmem:[%s1344_s6 + $0x70] sm:$0xff] %v651_v42  ;;  %684 = vst [vmem:[%s1344_s6 + $0x78] sm:$0xff] %v652_v32 }
 0x33b   : > { %689 = vst [vmem:[%s1344_s6 + $0xa0] sm:$0xff] %v657_v33  ;;  %690 = vst [vmem:[%s1344_s6 + $0xa8] sm:$0xff] %v658_v0  ;;  %v612_v1 = vpop.permute.xlu1 %611  ;;  %v624_v19 = vpop.permute.xlu0 %623 }
 0x33c   : > { %v655_v54 = vmul.f32 %v612_v1, %v1174_v5  ;;  %v656_v44 = vmul.f32 %v612_v1, %v1177_v6  ;;  %v661_v45 = vmul.f32 %v624_v19, %v1224_v24  ;;  %v662_v12 = vmul.f32 %v624_v19, %v1227_v25  ;;  %v1481_v6 = vld [vmem:[#allocation11_spill] sm:$0xff] }
 0x33e   : > { %687 = vst [vmem:[%s1344_s6 + $0x90] sm:$0xff] %v655_v54  ;;  %688 = vst [vmem:[%s1344_s6 + $0x98] sm:$0xff] %v656_v44 }
 0x33f   : > { %693 = vst [vmem:[%s1344_s6 + $0xc0] sm:$0xff] %v661_v45  ;;  %694 = vst [vmem:[%s1344_s6 + $0xc8] sm:$0xff] %v662_v12  ;;  %v620_v13 = vpop.permute.xlu1 %619  ;;  %v632_v30 = vpop.permute.xlu0 %631 }
 0x340   : > { %v659_v5 = vmul.f32 %v620_v13, %v1208_v18  ;;  %v660_v60 = vmul.f32 %v620_v13, %v1480_v57  ;;  %v665_v61 = vmul.f32 %v632_v30, %v1481_v6  ;;  %v666_v24 = vmul.f32 %v632_v30, %v1482_v10 }
 0x342   : > { %691 = vst [vmem:[%s1344_s6 + $0xb0] sm:$0xff] %v659_v5  ;;  %692 = vst [vmem:[%s1344_s6 + $0xb8] sm:$0xff] %v660_v60 }
 0x343   : > { %697 = vst [vmem:[%s1344_s6 + $0xe0] sm:$0xff] %v665_v61  ;;  %698 = vst [vmem:[%s1344_s6 + $0xe8] sm:$0xff] %v666_v24  ;;  %v628_v25 = vpop.permute.xlu1 %627 }
 0x344   : > { %v663_v34 = vmul.f32 %v628_v25, %v1483_v29  ;;  %v664_v35 = vmul.f32 %v628_v25, %v1484_v3 }
 0x346   : > { %695 = vst [vmem:[%s1344_s6 + $0xd0] sm:$0xff] %v663_v34  ;;  %696 = vst [vmem:[%s1344_s6 + $0xd8] sm:$0xff] %v664_v35 }
 0x347   : > { %v636_v18 = vpop.permute.xlu1 %635 }
 0x348   : > { %v667_v7 = vmul.f32 %v636_v18, %v1485_v40  ;;  %v668_v46 = vmul.f32 %v636_v18, %v1486_v11 }
 0x34a   : > { %699 = vst [vmem:[%s1344_s6 + $0xf0] sm:$0xff] %v667_v7  ;;  %700 = vst [vmem:[%s1344_s6 + $0xf8] sm:$0xff] %v668_v46 }
 0x34b   : > { %960 = shalt.err (!%p957_p1)
}
 0x34c   : > { %s961_s28 = scalar_lea.hbm %s1407_s19, 4096  ;;  %s965_s10 = scalar_lea.hbm %s1459_s3, 16384 }
 0x34d   : > { %p962_p3 = scmp.ne.s32.totalorder %s1407_s19, %s961_s28  ;;  %p966_p0 = scmp.lt.u32.totalorder %s1407_s19, %s1459_s3 }
 0x34e   : > { %p967_p2 = scmp.lt.u32.totalorder %s965_s10, %s961_s28  ;;  %p969_p6 = scmp.lt.u32.totalorder %s961_s28, %s1407_s19 }
 0x34f   : > { %p963_p4 = pnand %p962_p3, %p1487_p10 }
 0x350   : > { %p968_p7 = por %p967_p2, %p966_p0 }
 0x351   : > { %p964_p5 = pneg %p963_p4 }
 0x352   : > { %p970_p11 = por %p969_p6, %p968_p7 }
 0x354   : > { %p971_p12 = pnand %p970_p11, %p964_p5 }
 0x356   : > { %974 = shalt.err (!%p971_p12)
}
 0x357   : > { %s1022_s4 = smov 256   ;;  %s1023_s6 = smov 16  }
 0x358   : > { %862 = dma.vmem_to_hbm [thread:$0]  (%p1487_p10), %s1409_s7, 4096, %s1407_s19, %s702_s16, %s1022_s4, %s1022_s4, %s1023_s6  }
 0x359 PF: > { %p873_p8 = scmp.ge.s32.totalorder %s1013_s15, 2  ;;  %s731_s9 = sand.u32 1, %s1001_s12  }
 0x35a   : > { %p1488_p9 = scmp.ne.s32.totalorder %s1471_s25, 0  ;;  %s732_s8 = scalar_lea.sflag [#allocation4], %s731_s9 }
 0x35c   : > { %p869_p13 = pnand %p873_p8, %p1488_p9 }
 0x35e   : > { %996 = dma.done.wait (!%p869_p13), %s732_s8, 4096  }
 0x35f   : > { %998 = vsyncadd (!%p869_p13), %s732_s8, 4294963200  ;;  %p16_p1 = scmp.ge.s32.totalorder %s1069_s18, 6   ;;  %s1489_s12 = smov %s1005_s13 }
 0x360   : > { %s1490_s13 = smov %s1009_s14  ;;  %s1491_s14 = smov %s1081_s21 }
 0x361   : > { %s1492_s15 = smov %s1069_s18  ;;  %18 = sbr.rel (!%p16_p1) target bundleno = 5 (0x5), region = 77 }
 0x368   :  { %737 = vsyncpa [#allocation3], 1 }
 0x369   :  { %739 = vsyncpa [#allocation3 + $0x1], 1 }
 0x36a   :  { %740 = vsyncpa [#allocation4], 1 }
 0x36b   :  { %742 = vsyncpa [#allocation4 + $0x1], 1 }

</bundles_post_ra>
